<compile_context>
chip_gen: v7x
topology: tpu7x:2x2x1
jax: 0.10.0
libtpu: 0.0.40
codegen_flags: <defaults>
</compile_context>

<pallas_src>
import functools

import jax
import jax.numpy as jnp
from jax.experimental import pallas as pl
from jax.experimental.pallas import tpu as pltpu

DFF = 2048          # Feedforward_alpha.dff
DFF_CHUNK = 512     # DFF lanes processed per fused chunk


def _ffn_alpha_kernel(B, S, chunk,
                      alpha_ref,                               # SMEM (H,) f32
                      x_ref, w1_ref, b1_ref, w2t_ref, b2_ref,  # VMEM tiles
                      o_ref):
    """Single grid step: DFF-chunked fused FFN + alpha-weighted head reduction.

    x_ref is (B*H*S, D) f32 in natural (b, h, s) row order (free wrapper reshape,
    no transpose / no cast); w1_ref is (D, DFF) bf16; w2t_ref is W2^T stored
    lane-dense as (D, DFF) bf16.
    """
    H = alpha_ref.shape[0]
    BS = B * S
    D = x_ref.shape[1]
    dff = w1_ref.shape[1]
    n_chunks = dff // chunk

    # alpha scalars: read once from SMEM, reused across all chunks.
    alphas = [alpha_ref[h] for h in range(H)]
    alpha_sum = alphas[0]
    for a in alphas[1:]:
        alpha_sum = alpha_sum + a

    # All H*B*S rows go through matmul-1 together; the bf16 copy is a cheap
    # in-register cast (x itself never takes an extra HBM pass).
    x_bf = x_ref[...].astype(jnp.bfloat16)                      # (B*H*S, D)

    y = jnp.zeros((BS, D), jnp.float32)                         # matmul-2 accumulator
    for c in range(n_chunks):                                   # fully unrolled, static offsets
        lo = c * chunk
        w1c = w1_ref[:, lo:lo + chunk]                          # (D, chunk) bf16
        b1c = b1_ref[:, lo:lo + chunk]                          # (1, chunk) f32
        hid = jnp.dot(x_bf, w1c, preferred_element_type=jnp.float32)
        hid = jnp.maximum(hid + b1c, 0.0)                       # relu; dropout = identity (eval)

        # alpha-weighted head reduction: row (b, h, s) lives at (b*H + h)*S + s.
        # Slices are static and sublane-aligned (S multiple of 8).
        per_b = []
        for b in range(B):
            r = alphas[0] * hid[(b * H) * S:(b * H + 1) * S, :]
            for h in range(1, H):
                r = r + alphas[h] * hid[(b * H + h) * S:(b * H + h + 1) * S, :]
            per_b.append(r)
        acc = per_b[0] if B == 1 else jnp.concatenate(per_b, axis=0)   # (B*S, chunk) f32

        # matmul-2 chunk: f32 LHS (no precision-losing downcast), contract the chunk
        # axis against the lane-dense W2^T slab (A @ B^T dimension numbers).
        w2c = w2t_ref[:, lo:lo + chunk].astype(jnp.float32)     # (D, chunk)
        y = y + jax.lax.dot_general(acc, w2c, (((1,), (1,)), ((), ())),
                                    preferred_element_type=jnp.float32)

    o_ref[...] = (y + alpha_sum * b2_ref[...]).astype(o_ref.dtype)


def prepare_params(w1, b1, w2, b2, alpha):
    """One-time parameter prep (outside the hot path): persistent bf16 weights,
    W2 pre-transposed into a lane-dense (D, DFF) slab, 2-D biases, f32 alpha."""
    D, dff = w1.shape
    return {
        "w1": w1.astype(jnp.bfloat16),                   # (D, DFF)
        "b1": b1.reshape(1, dff).astype(jnp.float32),    # (1, DFF)
        "w2t": w2.T.astype(jnp.bfloat16),                # (D, DFF)  lane-dense
        "b2": b2.reshape(1, D).astype(jnp.float32),      # (1, D)
        "alpha": alpha.astype(jnp.float32),              # (H,)
    }


def feedforward_alpha(x, params, *, chunk=DFF_CHUNK):
    """x: (B, H, S, D) f32; params from prepare_params().  Returns (B, S, D) f32."""
    B, H, S, D = x.shape
    w1, b1, w2t, b2, alpha = (params["w1"], params["b1"], params["w2t"],
                              params["b2"], params["alpha"])
    dff = w1.shape[1]
    assert w1.shape == (D, dff) and w2t.shape == (D, dff)
    assert b1.shape == (1, dff) and b2.shape == (1, D) and alpha.shape == (H,)
    assert dff % chunk == 0 and S % 8 == 0

    # Free reshape (pure leading-dim merge): no HBM copy, no transpose, no cast.
    x2d = x.reshape(B * H * S, D)

    kernel = functools.partial(_ffn_alpha_kernel, B, S, chunk)

    out = pl.pallas_call(
        kernel,
        out_shape=jax.ShapeDtypeStruct((B * S, D), jnp.float32),
        grid_spec=pltpu.PrefetchScalarGridSpec(
            num_scalar_prefetch=0,
            grid=(1,),  # launch/DMA bound at this size: one step, no pipeline overhead
            in_specs=[
                # alpha: whole (H,) vector in SMEM, read as scalars
                pl.BlockSpec(memory_space=pltpu.MemorySpace.SMEM),
                # x rows in natural (b, h, s) order
                pl.BlockSpec((B * H * S, D), lambda i: (0, 0)),
                # W1 (D, DFF) bf16
                pl.BlockSpec((D, dff), lambda i: (0, 0)),
                # b1 (1, DFF) f32 (sliced per chunk inside the kernel)
                pl.BlockSpec((1, dff), lambda i: (0, 0)),
                # W2^T (D, DFF) bf16 — lane-dense weight slab
                pl.BlockSpec((D, dff), lambda i: (0, 0)),
                # b2 (1, D) f32
                pl.BlockSpec((1, D), lambda i: (0, 0)),
            ],
            out_specs=pl.BlockSpec((B * S, D), lambda i: (0, 0)),
        ),
        compiler_params=pltpu.CompilerParams(
            dimension_semantics=("arbitrary",),
        ),
    )(alpha, x2d, w1, b1, w2t, b2)
    return out.reshape(B, S, D)


def reference(x, w1, b1, w2, b2, alpha):
    h = jax.nn.relu(jnp.einsum("bhsd,df->bhsf", x, w1) + b1)
    y = jnp.einsum("bhsf,fd->bhsd", h, w2) + b2
    y = y * alpha[None, :, None, None]
    return jnp.sum(y, axis=1)


if __name__ == "__main__":
    # Small, deterministic problem consistent with the module's forward:
    # dmodel=32, heads=2, batch=2, seq=8   (dff fixed to 2048 by the class).
    B, H, S, D = 2, 2, 8, 32

    key = jax.random.PRNGKey(0)
    kx, kw1, kb1, kw2, kb2, ka = jax.random.split(key, 6)

    x = jax.random.normal(kx, (B, H, S, D), dtype=jnp.float32)
    # nn.Linear-style init (uniform +-1/sqrt(fan_in)), deterministic in-script.
    w1 = jax.random.uniform(kw1, (D, DFF), minval=-1.0, maxval=1.0) / jnp.sqrt(D)
    b1 = jax.random.uniform(kb1, (DFF,), minval=-1.0, maxval=1.0) / jnp.sqrt(D)
    w2 = jax.random.uniform(kw2, (DFF, D), minval=-1.0, maxval=1.0) / jnp.sqrt(DFF)
    b2 = jax.random.uniform(kb2, (D,), minval=-1.0, maxval=1.0) / jnp.sqrt(DFF)
    alpha = jax.random.normal(ka, (H,), dtype=jnp.float32)  # torch.randn(heads)

    params = prepare_params(w1, b1, w2, b2, alpha)  # one-time, outside the hot path
    out = feedforward_alpha(x, params)
    out = jax.block_until_ready(out)

    ref = reference(x, w1, b1, w2, b2, alpha)
    assert out.shape == (B, S, D)
    # bf16 weights (f32 activations/accumulation) vs pure-f32 reference.
    assert jnp.allclose(out, ref, atol=3e-2, rtol=3e-2), "mismatch vs reference"

    print("KERNEL_OK")
</pallas_src>

<mosaic_0001>
module attributes {stable_mosaic.version = 11 : i64} {
  func.func @_ffn_alpha_kernel(%arg0: i32, %arg1: memref<2xf32, #tpu.memory_space<smem>>, %arg2: memref<32x32xf32, #tpu.memory_space<vmem>>, %arg3: memref<32x2048xbf16, #tpu.memory_space<vmem>>, %arg4: memref<1x2048xf32, #tpu.memory_space<vmem>>, %arg5: memref<32x2048xbf16, #tpu.memory_space<vmem>>, %arg6: memref<1x32xf32, #tpu.memory_space<vmem>>, %arg7: memref<16x32xf32, #tpu.memory_space<vmem>>) attributes {dimension_semantics = [#tpu.dimension_semantics<arbitrary>], iteration_bounds = array<i64: 1>, scalar_prefetch = 0 : i64, scratch_operands = 0 : i64, tpu.core_type = #tpu.core_type<tc>, window_params = [{transform_indices = @transform_0, window_bounds = array<i64: 2>}, {pipeline_mode = #tpu.pipeline_mode<synchronous>, transform_indices = @transform_1, window_bounds = array<i64: 32, 32>}, {pipeline_mode = #tpu.pipeline_mode<synchronous>, transform_indices = @transform_2, window_bounds = array<i64: 32, 2048>}, {pipeline_mode = #tpu.pipeline_mode<synchronous>, transform_indices = @transform_3, window_bounds = array<i64: 1, 2048>}, {pipeline_mode = #tpu.pipeline_mode<synchronous>, transform_indices = @transform_4, window_bounds = array<i64: 32, 2048>}, {pipeline_mode = #tpu.pipeline_mode<synchronous>, transform_indices = @transform_5, window_bounds = array<i64: 1, 32>}, {pipeline_mode = #tpu.pipeline_mode<synchronous>, transform_indices = @transform_6, window_bounds = array<i64: 16, 32>}]} {
    %c0 = arith.constant 0 : index
    %0 = memref.load %arg1[%c0] : memref<2xf32, #tpu.memory_space<smem>>
    %c1 = arith.constant 1 : index
    %1 = memref.load %arg1[%c1] : memref<2xf32, #tpu.memory_space<smem>>
    %2 = arith.addf %0, %1 : f32
    %c0_0 = arith.constant 0 : index
    %c0_1 = arith.constant 0 : index
    %3 = vector.load %arg2[%c0_0, %c0_1] : memref<32x32xf32, #tpu.memory_space<vmem>>, vector<32x32xf32>
    %4 = arith.truncf %3 : vector<32x32xf32> to vector<32x32xbf16>
    %cst = arith.constant 0.000000e+00 : f32
    %5 = vector.broadcast %cst : f32 to vector<16x32xf32>
    %c0_2 = arith.constant 0 : index
    %c0_3 = arith.constant 0 : index
    %6 = vector.load %arg3[%c0_2, %c0_3] : memref<32x2048xbf16, #tpu.memory_space<vmem>>, vector<32x512xbf16>
    %c0_4 = arith.constant 0 : index
    %c0_5 = arith.constant 0 : index
    %7 = vector.load %arg4[%c0_4, %c0_5] : memref<1x2048xf32, #tpu.memory_space<vmem>>, vector<1x512xf32>
    %cst_6 = arith.constant dense<0.000000e+00> : vector<32x512xf32>
    %8 = tpu.matmul %4, %6, %cst_6 {dimension_numbers = #tpu.dot_dimension_numbers<[1], [0], [0], [1], [0, 0, 1, 1], [], []>} : vector<32x32xbf16>, vector<32x512xbf16>, vector<32x512xf32> -> vector<32x512xf32>
    %9 = vector.broadcast %7 : vector<1x512xf32> to vector<32x512xf32>
    %10 = arith.addf %8, %9 : vector<32x512xf32>
    %cst_7 = arith.constant 0.000000e+00 : f32
    %11 = vector.broadcast %cst_7 : f32 to vector<32x512xf32>
    %12 = arith.maximumf %10, %11 : vector<32x512xf32>
    %13 = vector.extract_strided_slice %12 {offsets = [0, 0], sizes = [8, 512], strides = [1, 1]} : vector<32x512xf32> to vector<8x512xf32>
    %14 = vector.broadcast %0 : f32 to vector<8x512xf32>
    %15 = arith.mulf %14, %13 : vector<8x512xf32>
    %16 = vector.extract_strided_slice %12 {offsets = [8, 0], sizes = [8, 512], strides = [1, 1]} : vector<32x512xf32> to vector<8x512xf32>
    %17 = vector.broadcast %1 : f32 to vector<8x512xf32>
    %18 = arith.mulf %17, %16 : vector<8x512xf32>
    %19 = arith.addf %15, %18 : vector<8x512xf32>
    %20 = vector.extract_strided_slice %12 {offsets = [16, 0], sizes = [8, 512], strides = [1, 1]} : vector<32x512xf32> to vector<8x512xf32>
    %21 = vector.broadcast %0 : f32 to vector<8x512xf32>
    %22 = arith.mulf %21, %20 : vector<8x512xf32>
    %23 = vector.extract_strided_slice %12 {offsets = [24, 0], sizes = [8, 512], strides = [1, 1]} : vector<32x512xf32> to vector<8x512xf32>
    %24 = vector.broadcast %1 : f32 to vector<8x512xf32>
    %25 = arith.mulf %24, %23 : vector<8x512xf32>
    %26 = arith.addf %22, %25 : vector<8x512xf32>
    %27 = tpu.concatenate %19, %26 in 0 : vector<8x512xf32>, vector<8x512xf32> -> vector<16x512xf32>
    %c0_8 = arith.constant 0 : index
    %c0_9 = arith.constant 0 : index
    %28 = vector.load %arg5[%c0_8, %c0_9] : memref<32x2048xbf16, #tpu.memory_space<vmem>>, vector<32x512xbf16>
    %29 = arith.extf %28 : vector<32x512xbf16> to vector<32x512xf32>
    %cst_10 = arith.constant dense<0.000000e+00> : vector<16x32xf32>
    %30 = tpu.matmul %27, %29, %cst_10 {dimension_numbers = #tpu.dot_dimension_numbers<[1], [1], [0], [0], [0, 0, 1, 0], [], []>} : vector<16x512xf32>, vector<32x512xf32>, vector<16x32xf32> -> vector<16x32xf32>
    %31 = arith.addf %5, %30 : vector<16x32xf32>
    %c0_11 = arith.constant 0 : index
    %c512 = arith.constant 512 : index
    %32 = vector.load %arg3[%c0_11, %c512] : memref<32x2048xbf16, #tpu.memory_space<vmem>>, vector<32x512xbf16>
    %c0_12 = arith.constant 0 : index
    %c512_13 = arith.constant 512 : index
    %33 = vector.load %arg4[%c0_12, %c512_13] : memref<1x2048xf32, #tpu.memory_space<vmem>>, vector<1x512xf32>
    %cst_14 = arith.constant dense<0.000000e+00> : vector<32x512xf32>
    %34 = tpu.matmul %4, %32, %cst_14 {dimension_numbers = #tpu.dot_dimension_numbers<[1], [0], [0], [1], [0, 0, 1, 1], [], []>} : vector<32x32xbf16>, vector<32x512xbf16>, vector<32x512xf32> -> vector<32x512xf32>
    %35 = vector.broadcast %33 : vector<1x512xf32> to vector<32x512xf32>
    %36 = arith.addf %34, %35 : vector<32x512xf32>
    %cst_15 = arith.constant 0.000000e+00 : f32
    %37 = vector.broadcast %cst_15 : f32 to vector<32x512xf32>
    %38 = arith.maximumf %36, %37 : vector<32x512xf32>
    %39 = vector.extract_strided_slice %38 {offsets = [0, 0], sizes = [8, 512], strides = [1, 1]} : vector<32x512xf32> to vector<8x512xf32>
    %40 = vector.broadcast %0 : f32 to vector<8x512xf32>
    %41 = arith.mulf %40, %39 : vector<8x512xf32>
    %42 = vector.extract_strided_slice %38 {offsets = [8, 0], sizes = [8, 512], strides = [1, 1]} : vector<32x512xf32> to vector<8x512xf32>
    %43 = vector.broadcast %1 : f32 to vector<8x512xf32>
    %44 = arith.mulf %43, %42 : vector<8x512xf32>
    %45 = arith.addf %41, %44 : vector<8x512xf32>
    %46 = vector.extract_strided_slice %38 {offsets = [16, 0], sizes = [8, 512], strides = [1, 1]} : vector<32x512xf32> to vector<8x512xf32>
    %47 = vector.broadcast %0 : f32 to vector<8x512xf32>
    %48 = arith.mulf %47, %46 : vector<8x512xf32>
    %49 = vector.extract_strided_slice %38 {offsets = [24, 0], sizes = [8, 512], strides = [1, 1]} : vector<32x512xf32> to vector<8x512xf32>
    %50 = vector.broadcast %1 : f32 to vector<8x512xf32>
    %51 = arith.mulf %50, %49 : vector<8x512xf32>
    %52 = arith.addf %48, %51 : vector<8x512xf32>
    %53 = tpu.concatenate %45, %52 in 0 : vector<8x512xf32>, vector<8x512xf32> -> vector<16x512xf32>
    %c0_16 = arith.constant 0 : index
    %c512_17 = arith.constant 512 : index
    %54 = vector.load %arg5[%c0_16, %c512_17] : memref<32x2048xbf16, #tpu.memory_space<vmem>>, vector<32x512xbf16>
    %55 = arith.extf %54 : vector<32x512xbf16> to vector<32x512xf32>
    %cst_18 = arith.constant dense<0.000000e+00> : vector<16x32xf32>
    %56 = tpu.matmul %53, %55, %cst_18 {dimension_numbers = #tpu.dot_dimension_numbers<[1], [1], [0], [0], [0, 0, 1, 0], [], []>} : vector<16x512xf32>, vector<32x512xf32>, vector<16x32xf32> -> vector<16x32xf32>
    %57 = arith.addf %31, %56 : vector<16x32xf32>
    %c0_19 = arith.constant 0 : index
    %c1024 = arith.constant 1024 : index
    %58 = vector.load %arg3[%c0_19, %c1024] : memref<32x2048xbf16, #tpu.memory_space<vmem>>, vector<32x512xbf16>
    %c0_20 = arith.constant 0 : index
    %c1024_21 = arith.constant 1024 : index
    %59 = vector.load %arg4[%c0_20, %c1024_21] : memref<1x2048xf32, #tpu.memory_space<vmem>>, vector<1x512xf32>
    %cst_22 = arith.constant dense<0.000000e+00> : vector<32x512xf32>
    %60 = tpu.matmul %4, %58, %cst_22 {dimension_numbers = #tpu.dot_dimension_numbers<[1], [0], [0], [1], [0, 0, 1, 1], [], []>} : vector<32x32xbf16>, vector<32x512xbf16>, vector<32x512xf32> -> vector<32x512xf32>
    %61 = vector.broadcast %59 : vector<1x512xf32> to vector<32x512xf32>
    %62 = arith.addf %60, %61 : vector<32x512xf32>
    %cst_23 = arith.constant 0.000000e+00 : f32
    %63 = vector.broadcast %cst_23 : f32 to vector<32x512xf32>
    %64 = arith.maximumf %62, %63 : vector<32x512xf32>
    %65 = vector.extract_strided_slice %64 {offsets = [0, 0], sizes = [8, 512], strides = [1, 1]} : vector<32x512xf32> to vector<8x512xf32>
    %66 = vector.broadcast %0 : f32 to vector<8x512xf32>
    %67 = arith.mulf %66, %65 : vector<8x512xf32>
    %68 = vector.extract_strided_slice %64 {offsets = [8, 0], sizes = [8, 512], strides = [1, 1]} : vector<32x512xf32> to vector<8x512xf32>
    %69 = vector.broadcast %1 : f32 to vector<8x512xf32>
    %70 = arith.mulf %69, %68 : vector<8x512xf32>
    %71 = arith.addf %67, %70 : vector<8x512xf32>
    %72 = vector.extract_strided_slice %64 {offsets = [16, 0], sizes = [8, 512], strides = [1, 1]} : vector<32x512xf32> to vector<8x512xf32>
    %73 = vector.broadcast %0 : f32 to vector<8x512xf32>
    %74 = arith.mulf %73, %72 : vector<8x512xf32>
    %75 = vector.extract_strided_slice %64 {offsets = [24, 0], sizes = [8, 512], strides = [1, 1]} : vector<32x512xf32> to vector<8x512xf32>
    %76 = vector.broadcast %1 : f32 to vector<8x512xf32>
    %77 = arith.mulf %76, %75 : vector<8x512xf32>
    %78 = arith.addf %74, %77 : vector<8x512xf32>
    %79 = tpu.concatenate %71, %78 in 0 : vector<8x512xf32>, vector<8x512xf32> -> vector<16x512xf32>
    %c0_24 = arith.constant 0 : index
    %c1024_25 = arith.constant 1024 : index
    %80 = vector.load %arg5[%c0_24, %c1024_25] : memref<32x2048xbf16, #tpu.memory_space<vmem>>, vector<32x512xbf16>
    %81 = arith.extf %80 : vector<32x512xbf16> to vector<32x512xf32>
    %cst_26 = arith.constant dense<0.000000e+00> : vector<16x32xf32>
    %82 = tpu.matmul %79, %81, %cst_26 {dimension_numbers = #tpu.dot_dimension_numbers<[1], [1], [0], [0], [0, 0, 1, 0], [], []>} : vector<16x512xf32>, vector<32x512xf32>, vector<16x32xf32> -> vector<16x32xf32>
    %83 = arith.addf %57, %82 : vector<16x32xf32>
    %c0_27 = arith.constant 0 : index
    %c1536 = arith.constant 1536 : index
    %84 = vector.load %arg3[%c0_27, %c1536] : memref<32x2048xbf16, #tpu.memory_space<vmem>>, vector<32x512xbf16>
    %c0_28 = arith.constant 0 : index
    %c1536_29 = arith.constant 1536 : index
    %85 = vector.load %arg4[%c0_28, %c1536_29] : memref<1x2048xf32, #tpu.memory_space<vmem>>, vector<1x512xf32>
    %cst_30 = arith.constant dense<0.000000e+00> : vector<32x512xf32>
    %86 = tpu.matmul %4, %84, %cst_30 {dimension_numbers = #tpu.dot_dimension_numbers<[1], [0], [0], [1], [0, 0, 1, 1], [], []>} : vector<32x32xbf16>, vector<32x512xbf16>, vector<32x512xf32> -> vector<32x512xf32>
    %87 = vector.broadcast %85 : vector<1x512xf32> to vector<32x512xf32>
    %88 = arith.addf %86, %87 : vector<32x512xf32>
    %cst_31 = arith.constant 0.000000e+00 : f32
    %89 = vector.broadcast %cst_31 : f32 to vector<32x512xf32>
    %90 = arith.maximumf %88, %89 : vector<32x512xf32>
    %91 = vector.extract_strided_slice %90 {offsets = [0, 0], sizes = [8, 512], strides = [1, 1]} : vector<32x512xf32> to vector<8x512xf32>
    %92 = vector.broadcast %0 : f32 to vector<8x512xf32>
    %93 = arith.mulf %92, %91 : vector<8x512xf32>
    %94 = vector.extract_strided_slice %90 {offsets = [8, 0], sizes = [8, 512], strides = [1, 1]} : vector<32x512xf32> to vector<8x512xf32>
    %95 = vector.broadcast %1 : f32 to vector<8x512xf32>
    %96 = arith.mulf %95, %94 : vector<8x512xf32>
    %97 = arith.addf %93, %96 : vector<8x512xf32>
    %98 = vector.extract_strided_slice %90 {offsets = [16, 0], sizes = [8, 512], strides = [1, 1]} : vector<32x512xf32> to vector<8x512xf32>
    %99 = vector.broadcast %0 : f32 to vector<8x512xf32>
    %100 = arith.mulf %99, %98 : vector<8x512xf32>
    %101 = vector.extract_strided_slice %90 {offsets = [24, 0], sizes = [8, 512], strides = [1, 1]} : vector<32x512xf32> to vector<8x512xf32>
    %102 = vector.broadcast %1 : f32 to vector<8x512xf32>
    %103 = arith.mulf %102, %101 : vector<8x512xf32>
    %104 = arith.addf %100, %103 : vector<8x512xf32>
    %105 = tpu.concatenate %97, %104 in 0 : vector<8x512xf32>, vector<8x512xf32> -> vector<16x512xf32>
    %c0_32 = arith.constant 0 : index
    %c1536_33 = arith.constant 1536 : index
    %106 = vector.load %arg5[%c0_32, %c1536_33] : memref<32x2048xbf16, #tpu.memory_space<vmem>>, vector<32x512xbf16>
    %107 = arith.extf %106 : vector<32x512xbf16> to vector<32x512xf32>
    %cst_34 = arith.constant dense<0.000000e+00> : vector<16x32xf32>
    %108 = tpu.matmul %105, %107, %cst_34 {dimension_numbers = #tpu.dot_dimension_numbers<[1], [1], [0], [0], [0, 0, 1, 0], [], []>} : vector<16x512xf32>, vector<32x512xf32>, vector<16x32xf32> -> vector<16x32xf32>
    %109 = arith.addf %83, %108 : vector<16x32xf32>
    %c0_35 = arith.constant 0 : index
    %c0_36 = arith.constant 0 : index
    %110 = vector.load %arg6[%c0_35, %c0_36] : memref<1x32xf32, #tpu.memory_space<vmem>>, vector<1x32xf32>
    %111 = vector.broadcast %2 : f32 to vector<1x32xf32>
    %112 = arith.mulf %111, %110 : vector<1x32xf32>
    %113 = vector.broadcast %112 : vector<1x32xf32> to vector<16x32xf32>
    %114 = arith.addf %109, %113 : vector<16x32xf32>
    %c0_37 = arith.constant 0 : index
    %c0_38 = arith.constant 0 : index
    %115 = vector.load %arg7[%c0_37, %c0_38] : memref<16x32xf32, #tpu.memory_space<vmem>>, vector<16x32xf32>
    tpu.vector_store %arg7[%c0_37, %c0_38], %114 {strides = array<i32>} : memref<16x32xf32, #tpu.memory_space<vmem>>, vector<16x32xf32>,
    return
  }
  func.func @transform_0(%arg0: i32) -> i32 {
    %c0_i32 = arith.constant 0 : i32
    %c0_i32_0 = arith.constant 0 : i32
    return %c0_i32 : i32
  }
  func.func @transform_1(%arg0: i32) -> (i32, i32) {
    %c0_i32 = arith.constant 0 : i32
    %c0_i32_0 = arith.constant 0 : i32
    %c0_i32_1 = arith.constant 0 : i32
    return %c0_i32, %c0_i32_0 : i32, i32
  }
  func.func @transform_2(%arg0: i32) -> (i32, i32) {
    %c0_i32 = arith.constant 0 : i32
    %c0_i32_0 = arith.constant 0 : i32
    %c0_i32_1 = arith.constant 0 : i32
    return %c0_i32, %c0_i32_0 : i32, i32
  }
  func.func @transform_3(%arg0: i32) -> (i32, i32) {
    %c0_i32 = arith.constant 0 : i32
    %c0_i32_0 = arith.constant 0 : i32
    %c0_i32_1 = arith.constant 0 : i32
    return %c0_i32, %c0_i32_0 : i32, i32
  }
  func.func @transform_4(%arg0: i32) -> (i32, i32) {
    %c0_i32 = arith.constant 0 : i32
    %c0_i32_0 = arith.constant 0 : i32
    %c0_i32_1 = arith.constant 0 : i32
    return %c0_i32, %c0_i32_0 : i32, i32
  }
  func.func @transform_5(%arg0: i32) -> (i32, i32) {
    %c0_i32 = arith.constant 0 : i32
    %c0_i32_0 = arith.constant 0 : i32
    %c0_i32_1 = arith.constant 0 : i32
    return %c0_i32, %c0_i32_0 : i32, i32
  }
  func.func @transform_6(%arg0: i32) -> (i32, i32) {
    %c0_i32 = arith.constant 0 : i32
    %c0_i32_0 = arith.constant 0 : i32
    %c0_i32_1 = arith.constant 0 : i32
    return %c0_i32, %c0_i32_0 : i32, i32
  }
}

</mosaic_0001>

<bundles_post_ra>
// kernel: tpu_custom_call.1
= control target key start
LH: loop header
LB: loop body
LE: loop exit
PB: predicated region body
PF: predicated region fallthrough
CT: control target
= control target key end

     0   :  { %11 = vsyncpa [#allocation5], 0  ;;  %s2420_s0 = inlined_call_operand.hbm [shape: f32[2], index: 0, kind: input, shape index: {}]   ;;  %s2421_s1 = inlined_call_operand.hbm [shape: f32[32,32], index: 1, kind: input, shape index: {}]   ;;  %s2422_s2 = inlined_call_operand.hbm [shape: bf16[32,2048], index: 2, kind: input, shape index: {}]   ;;  %s2423_s3 = inlined_call_operand.hbm [shape: f32[1,2048], index: 3, kind: input, shape index: {}]   ;;  %s2424_s4 = inlined_call_operand.hbm [shape: bf16[32,2048], index: 4, kind: input, shape index: {}]   ;;  %s2425_s5 = inlined_call_operand.vmem [shape: f32[1,32], index: 5, kind: input, shape index: {}]   ;;  %s2426_s6 = inlined_call_operand.hbm [shape: f32[16,32], index: 6, kind: output, shape index: {}]  }
   0x1   :  { %12 = vsyncpa [#allocation3], 0 }
   0x2   :  { %13 = vsyncpa [#allocation8], 0 }
   0x3   :  { %14 = vsyncpa [#allocation11], 0 }
   0x4   :  { %15 = vsyncpa [#allocation4], 0  ;;  %s1990_s21 = smov [#allocation7]   ;;  %s1860_s25 = scalar_lea.hbm %s2422_s2, 4096 }
   0x5   :  { %s41_s22 = sshll.u32 %s1990_s21, 4  ;;  %p1861_p0 = scmp.ne.s32.totalorder %s2422_s2, %s1860_s25  ;;  %s42_s22 = int_to_ptr.vmem [resolvable:$true] %s41_s22 }
   0x6   :  { %p1864_p1 = scmp.lt.u32.totalorder %s1860_s25, %s2422_s2 }
   0x8   :  { %p1866_p2 = pnand %p1864_p1, %p1861_p0 }
   0xa   :  { %1869 = shalt.err (!%p1866_p2)
}
   0xb   :  { %s1870_s30 = scalar_lea.vmem %s42_s22, 4096  ;;  %p1875_p4 = scmp.lt.s32.totalorder %s42_s22, %s42_s22 }
   0xc   :  { %p1871_p3 = scmp.ne.s32.totalorder %s42_s22, %s1870_s30  ;;  %p1876_p5 = scmp.lt.s32.totalorder %s1870_s30, %s1870_s30 }
   0xe   :  { %p1877_p6 = por %p1876_p5, %p1875_p4 }
  0x10   :  { %p1878_p7 = pnand %p1877_p6, %p1871_p3 }
  0x12   :  { %1881 = shalt.err (!%p1878_p7)
}
  0x13   :  { %s1991_s7 = smov 1024   ;;  %s1992_s8 = smov 64  }
  0x14   :  { %47 = dma.hbm_to_vmem [thread:$0]  %s2422_s2, 4096, %s42_s22, [#allocation8], %s1991_s7, %s1991_s7, %s1992_s8  }
  0x15   :  { %s1882_s13 = scalar_lea.hbm %s2420_s0, 16 }
  0x16   :  { %p1883_p8 = scmp.ne.s32.totalorder %s2420_s0, %s1882_s13  ;;  %p1886_p9 = scmp.lt.u32.totalorder %s1882_s13, %s2420_s0 }
  0x18   :  { %p1888_p10 = pnand %p1886_p9, %p1883_p8 }
  0x1a   :  { %1891 = shalt.err (!%p1888_p10)
}
  0x1b   :  { %s1993_s18 = smov [#allocation2]   ;;  %s1994_s2 = smov [#allocation6]  }
  0x1c   :  { %23 = dma.hbm_to_smem %s2420_s0, 16, %s1993_s18, [#allocation5]  }
  0x1d   :  { %s29_s21 = sshll.u32 %s1994_s2, 4  ;;  %s1892_s24 = scalar_lea.hbm %s2421_s1, 512  ;;  %s30_s21 = int_to_ptr.vmem [resolvable:$true] %s29_s21 }
  0x1e   :  { %p1893_p11 = scmp.ne.s32.totalorder %s2421_s1, %s1892_s24  ;;  %p1896_p12 = scmp.lt.u32.totalorder %s1892_s24, %s2421_s1 }
  0x20   :  { %p1898_p13 = pnand %p1896_p12, %p1893_p11 }
  0x22   :  { %1901 = shalt.err (!%p1898_p13)
}
  0x23   :  { %s1902_s29 = scalar_lea.vmem %s30_s21, 512  ;;  %p1907_p1 = scmp.lt.s32.totalorder %s30_s21, %s30_s21 }
  0x24   :  { %p1903_p0 = scmp.ne.s32.totalorder %s30_s21, %s1902_s29  ;;  %p1908_p2 = scmp.lt.s32.totalorder %s1902_s29, %s1902_s29 }
  0x26   :  { %p1909_p3 = por %p1908_p2, %p1907_p1 }
  0x28   :  { %p1910_p4 = pnand %p1909_p3, %p1903_p0 }
  0x2a   :  { %1913 = shalt.err (!%p1910_p4)
}
  0x2b   :  { %s1995_s0 = smov 128   ;;  %s1996_s30 = smov 8  }
  0x2c   :  { %35 = dma.hbm_to_vmem [thread:$0]  %s2421_s1, 512, %s30_s21, [#allocation3], %s1995_s0, %s1995_s0, %s1996_s30  }
  0x2d   :  { %s1997_s11 = smov [#allocation9]   ;;  %s1998_s13 = smov [#allocation10]  }
  0x2e   :  { %s54_s12 = sshll.u32 %s1997_s11, 4  ;;  %s63_s14 = sshll.u32 %s1998_s13, 4  ;;  %s55_s12 = int_to_ptr.vmem [resolvable:$true] %s54_s12  ;;  %s64_s14 = int_to_ptr.vmem [resolvable:$true] %s63_s14 }
  0x2f   :  { %s1914_s17 = scalar_lea.hbm %s2423_s3, 256 }
  0x30   :  { %p1915_p5 = scmp.ne.s32.totalorder %s2423_s3, %s1914_s17  ;;  %p1918_p6 = scmp.lt.u32.totalorder %s1914_s17, %s2423_s3 }
  0x32   :  { %p1920_p7 = pnand %p1918_p6, %p1915_p5 }
  0x34   :  { %1923 = shalt.err (!%p1920_p7)
}
  0x35   :  { %s1924_s1 = scalar_lea.vmem %s55_s12, 256  ;;  %p1929_p9 = scmp.lt.s32.totalorder %s55_s12, %s55_s12 }
  0x36   :  { %p1925_p8 = scmp.ne.s32.totalorder %s55_s12, %s1924_s1  ;;  %p1930_p10 = scmp.lt.s32.totalorder %s1924_s1, %s1924_s1 }
  0x38   :  { %p1931_p11 = por %p1930_p10, %p1929_p9 }
  0x3a   :  { %p1932_p12 = pnand %p1931_p11, %p1925_p8 }
  0x3c   :  { %1935 = shalt.err (!%p1932_p12)
}
  0x3d   :  { %57 = dma.hbm_to_vmem [thread:$0]  %s2423_s3, 256, %s55_s12, [#allocation8]  }
  0x3e   :  { %s1936_s25 = scalar_lea.hbm %s2424_s4, 4096 }
  0x3f   :  { %p1937_p13 = scmp.ne.s32.totalorder %s2424_s4, %s1936_s25  ;;  %p1940_p0 = scmp.lt.u32.totalorder %s1936_s25, %s2424_s4 }
  0x41   :  { %p1942_p1 = pnand %p1940_p0, %p1937_p13 }
  0x43   :  { %1945 = shalt.err (!%p1942_p1)
}
  0x44   :  { %s1946_s9 = scalar_lea.vmem %s64_s14, 4096  ;;  %p1951_p3 = scmp.lt.s32.totalorder %s64_s14, %s64_s14 }
  0x45   :  { %p1947_p2 = scmp.ne.s32.totalorder %s64_s14, %s1946_s9  ;;  %p1952_p4 = scmp.lt.s32.totalorder %s1946_s9, %s1946_s9 }
  0x47   :  { %p1953_p5 = por %p1952_p4, %p1951_p3 }
  0x49   :  { %p1954_p6 = pnand %p1953_p5, %p1947_p2 }
  0x4b   :  { %1957 = shalt.err (!%p1954_p6)
}
  0x4c   :  { %69 = dma.hbm_to_vmem [thread:$0]  %s2424_s4, 4096, %s64_s14, [#allocation11], %s1991_s7, %s1991_s7, %s1992_s8  }
  0x4d   :  { %1980 = dma.done.wait [#allocation5], 16  }
  0x4e   :  { %1981 = vsyncadd [#allocation5], 4294967280 }
  0x4f   :  { %1982 = dma.done.wait [#allocation3], 512  }
  0x50   :  { %1983 = vsyncadd [#allocation3], 4294966784 }
  0x51   :  { %1984 = dma.done.wait [#allocation8], 4352  }
  0x52   :  { %1985 = vsyncadd [#allocation8], 4294962944 }
  0x53   :  { %1986 = dma.done.wait [#allocation11], 4096  }
  0x54   :  { %1987 = vsyncadd [#allocation11], 4294963200 }
  0x55   :  { %87 = sfence }
  0x56   :  { %v98_v0 = vld [vmem:[#allocation7] sm:$0xff]  ;;  %v99_v2 = vld [vmem:[#allocation7 + $0x8] sm:$0xff]  ;;  %v1999_v8 = vmov 0   ;;  %v347_v16 = vld [vmem:[#allocation7 + $0x10] sm:$0xff]  ;;  %vm168_vm0 = vcmask 261120   ;;  %v108_v63 = vlaneseq  ;;  %s2151_s4 = sld [smem:[#allocation2]] }
  0x57   :  { %v100_v1 = vld [vmem:[#allocation7 + $0x40] sm:$0xff]  ;;  %v101_v4 = vld [vmem:[#allocation7 + $0x48] sm:$0xff]  ;;  %207 = vmatprep.mubr.bf16.mxu0 %v1999_v8  ;;  %260 = vmatprep.mubr.bf16.mxu1 %v1999_v8  ;;  %v349_v17 = vld [vmem:[#allocation7 + $0x50] sm:$0xff]  ;;  %s2159_s7 = sld [smem:[#allocation2 + $0x1]] }
  0x58   :  { %v1706_v3 = vcombine.high %v98_v0, %v100_v1  ;;  %v1705_v5 = vcombine.low %v98_v0, %v100_v1  ;;  %v102_v6 = vld [vmem:[#allocation7 + $0x80] sm:$0xff]  ;;  %v1708_v9 = vcombine.high %v99_v2, %v101_v4  ;;  %v1707_v10 = vcombine.low %v99_v2, %v101_v4  ;;  %v103_v12 = vld [vmem:[#allocation7 + $0x88] sm:$0xff]  ;;  %v348_v20 = vld [vmem:[#allocation7 + $0x18] sm:$0xff] }
  0x59   :  { %v104_v7 = vld [vmem:[#allocation7 + $0xc0] sm:$0xff]  ;;  %v105_v13 = vld [vmem:[#allocation7 + $0xc8] sm:$0xff]  ;;  %v350_v21 = vld [vmem:[#allocation7 + $0x58] sm:$0xff]  ;;  %v1718_v23 = vcombine.high %v347_v16, %v349_v17  ;;  %v1717_v28 = vcombine.low %v347_v16, %v349_v17  ;;  %v109_v0 = vshrl.u32 %v108_v63, 7 }
  0x5a   :  { %v1710_v11 = vcombine.high %v102_v6, %v104_v7  ;;  %175 = vmatprep.subr.bf16.mxu0 %v1706_v3  ;;  %v1712_v14 = vcombine.high %v103_v12, %v105_v13  ;;  %v92_v15 = vld [vmem:[#allocation6] sm:$0xff]  ;;  %228 = vmatprep.subr.bf16.mxu1 %v1708_v9  ;;  %v1709_v18 = vcombine.low %v102_v6, %v104_v7  ;;  %v93_v19 = vld [vmem:[#allocation6 + $0x8] sm:$0xff]  ;;  %v351_v26 = vld [vmem:[#allocation7 + $0x90] sm:$0xff] }
  0x5b   :  { %176 = vmatpush1.bf16.msra.mxu0 %v1705_v5  ;;  %229 = vmatpush1.bf16.msra.mxu1 %v1707_v10  ;;  %v1711_v22 = vcombine.low %v103_v12, %v105_v13  ;;  %v1720_v24 = vcombine.high %v348_v20, %v350_v21  ;;  %v2107_v25 = vpack.c.bf16 %v93_v19, %v92_v15  ;;  %v353_v27 = vld [vmem:[#allocation7 + $0xd0] sm:$0xff]  ;;  %v352_v29 = vld [vmem:[#allocation7 + $0x98] sm:$0xff]  ;;  %v563_v39 = vld [vmem:[#allocation10 + $0x10] sm:$0xff]  ;;  %v2149_v1 = vsub.s32 0, %v109_v0 }
  0x5c   :  { %177 = vmatprep.subr.bf16.mxu0 %v1710_v11  ;;  %230 = vmatprep.subr.bf16.mxu1 %v1712_v14  ;;  %v354_v30 = vld [vmem:[#allocation7 + $0xd8] sm:$0xff]  ;;  %v1719_v31 = vcombine.low %v348_v20, %v350_v21  ;;  %v1722_v32 = vcombine.high %v351_v26, %v353_v27  ;;  %v94_v34 = vld [vmem:[#allocation6 + $0x10] sm:$0xff]  ;;  %v1721_v36 = vcombine.low %v351_v26, %v353_v27  ;;  %v565_v40 = vld [vmem:[#allocation10 + $0x50] sm:$0xff]  ;;  %v2153_v3 = vsub.s32 2, %v109_v0 }
  0x5d   :  { %v1724_v33 = vcombine.high %v352_v29, %v354_v30  ;;  %v95_v35 = vld [vmem:[#allocation6 + $0x18] sm:$0xff]  ;;  %v1723_v37 = vcombine.low %v352_v29, %v354_v30  ;;  %v564_v41 = vld [vmem:[#allocation10 + $0x18] sm:$0xff]  ;;  %v1817_v42 = vcombine.high %v563_v39, %v565_v40  ;;  %v1818_v44 = vcombine.low %v563_v39, %v565_v40  ;;  %v567_v47 = vld [vmem:[#allocation10 + $0x90] sm:$0xff]  ;;  %s91_s8 = sadd.f32 %s2159_s7, %s2151_s4 }
  0x5e   :  { %v2115_v38 = vpack.c.bf16 %v95_v35, %v94_v34  ;;  %v566_v43 = vld [vmem:[#allocation10 + $0x58] sm:$0xff]  ;;  %v569_v48 = vld [vmem:[#allocation10 + $0xd0] sm:$0xff]  ;;  %v2133_v55 = vld [vmem:[#allocation10] sm:$0xff]  ;;  %v2155_v4 = vsub.s32 1, %v109_v0  ;;  %v2157_v5 = vsub.s32 3, %v109_v0  ;;  %v2166_v15 = vstv %s2151_s4 }
  0x5f   :  { %178 = vmatpush1.bf16.msra.mxu0 %v1709_v18  ;;  %231 = vmatpush1.bf16.msra.mxu1 %v1711_v22  ;;  %v1821_v45 = vcombine.high %v564_v41, %v566_v43  ;;  %v1822_v46 = vcombine.low %v564_v41, %v566_v43  ;;  %v568_v49 = vld [vmem:[#allocation10 + $0x98] sm:$0xff]  ;;  %v1819_v50 = vcombine.high %v567_v47, %v569_v48  ;;  %v2135_v56 = vld [vmem:[#allocation10 + $0x40] sm:$0xff]  ;;  %v2137_v57 = vld [vmem:[#allocation10 + $0x8] sm:$0xff] }
  0x60   :  { %417 = vmatprep.subr.bf16.mxu0 %v1718_v23  ;;  %470 = vmatprep.subr.bf16.mxu1 %v1720_v24  ;;  %v570_v51 = vld [vmem:[#allocation10 + $0xd8] sm:$0xff]  ;;  %v1820_v52 = vcombine.low %v567_v47, %v569_v48  ;;  %v1825_v58 = vcombine.high %v2133_v55, %v2135_v56  ;;  %v2141_v59 = vld [vmem:[#allocation10 + $0x48] sm:$0xff]  ;;  %v1826_v60 = vcombine.low %v2133_v55, %v2135_v56  ;;  %v106_v2 = vld [vmem:[#allocation9] sm:$0xf]  ;;  %v2169_v23 = vstv %s2159_s7 }
  0x61   :  { %v1823_v53 = vcombine.high %v568_v49, %v570_v51  ;;  %v1824_v54 = vcombine.low %v568_v49, %v570_v51  ;;  %v1829_v61 = vcombine.high %v2137_v57, %v2141_v59  ;;  %v1830_v62 = vcombine.low %v2137_v57, %v2141_v59  ;;  %v355_v63 = vld [vmem:[#allocation9 + $0x4] sm:$0xf] }
  0x62   :  { %1713 = vmatmul.mubr.msk.bf16.vlgmr.msra.gmra.mrb[0].mxu0 %vm168_vm0, %v2107_v25  ;;  %1715 = vmatmul.mubr.msk.bf16.vlgmr.msra.gmra.mrb[0].mxu1 %vm168_vm0, %v2107_v25  ;;  %v111_v6 = vrot.slane %v106_v2, %v2149_v1  ;;  %v119_v7 = vrot.slane %v106_v2, %v2153_v3  ;;  %v115_v9 = vrot.slane %v106_v2, %v2155_v4  ;;  %v887_v55 = vld [vmem:[#allocation7 + $0x20] sm:$0xff] }
  0x63   :  { %418 = vmatpush1.bf16.msra.mxu0 %v1717_v28  ;;  %471 = vmatpush1.bf16.msra.mxu1 %v1719_v31  ;;  %v123_v10 = vrot.slane %v106_v2, %v2157_v5  ;;  %v889_v56 = vld [vmem:[#allocation7 + $0x60] sm:$0xff] }
  0x64   :  { %217 = vmatprep.mubr.bf16.mxu0 %v1999_v8  ;;  %270 = vmatprep.mubr.bf16.mxu1 %v1999_v8 }
  0x65   :  { %419 = vmatprep.subr.bf16.mxu0 %v1722_v32  ;;  %472 = vmatprep.subr.bf16.mxu1 %v1724_v33 }
  0x67   :  { %420 = vmatpush1.bf16.msra.mxu0 %v1721_v36  ;;  %473 = vmatpush1.bf16.msra.mxu1 %v1723_v37 }
  0x68   :  { %1754 = vmatprep.subr.bf16.mxu0 %v1817_v42  ;;  %1762 = vmatprep.subr.bf16.mxu1 %v1821_v45 }
  0x6a   :  { %1714 = vmatmul.mubr.msk.bf16.gmra.mrb[4].mxu0 %vm168_vm0, %v2115_v38  ;;  %1716 = vmatmul.mubr.msk.bf16.gmra.mrb[4].mxu1 %vm168_vm0, %v2115_v38 }
  0x6b   :  { %449 = vmatprep.mubr.bf16.mxu0 %v1999_v8  ;;  %502 = vmatprep.mubr.bf16.mxu1 %v1999_v8 }
  0x72   :  { %1725 = vmatmul.mubr.msk.bf16.vlgmr.msra.gmra.mrb[8].mxu0 %vm168_vm0, %v2107_v25  ;;  %1727 = vmatmul.mubr.msk.bf16.vlgmr.msra.gmra.mrb[8].mxu1 %vm168_vm0, %v2107_v25 }
  0x73   :  { %459 = vmatprep.mubr.bf16.mxu0 %v1999_v8  ;;  %512 = vmatprep.mubr.bf16.mxu1 %v1999_v8 }
  0x74   :  { %1756 = vmatpush1.bf16.xpose.msra.mxu0 %v1818_v44  ;;  %1764 = vmatpush1.bf16.xpose.msra.mxu1 %v1822_v46 }
  0x75   :  { %1758 = vmatprep.subr.bf16.mxu0 %v1819_v50  ;;  %1766 = vmatprep.subr.bf16.mxu1 %v1823_v53 }
  0x7a   :  { %1726 = vmatmul.mubr.msk.bf16.gmra.mrb[12].mxu0 %vm168_vm0, %v2115_v38  ;;  %1728 = vmatmul.mubr.msk.bf16.gmra.mrb[12].mxu1 %vm168_vm0, %v2115_v38 }
  0x7c   :  { %1760 = vmatpush1.bf16.xpose.msra.mxu0 %v1820_v52  ;;  %1768 = vmatpush1.bf16.xpose.msra.mxu1 %v1824_v54 }
  0x7d   :  { %1770 = vmatprep.subr.bf16.mxu0 %v1825_v58  ;;  %1778 = vmatprep.subr.bf16.mxu1 %v1829_v61 }
 0x135   :  { %v209_v11 = vpop.f32.mrb[0].mxu0  ;;  %v262_v13 = vpop.f32.mrb[0].mxu1 }
 0x136   :  { %v210_v12 = vadd.f32 %v209_v11, %v111_v6  ;;  %v211_v14 = vpop.f32.mrb[1].mxu0  ;;  %v263_v16 = vadd.f32 %v262_v13, %v119_v7  ;;  %v264_v18 = vpop.f32.mrb[1].mxu1 }
 0x137   :  { %v212_v17 = vadd.f32 %v211_v14, %v115_v9  ;;  %v213_v19 = vpop.f32.mrb[2].mxu0  ;;  %v265_v21 = vadd.f32 %v264_v18, %v123_v10  ;;  %v266_v24 = vpop.f32.mrb[2].mxu1 }
 0x138   :  { %v281_v20 = vmax.f32 %v210_v12, 0.0  ;;  %v214_v22 = vadd.f32 %v213_v19, %v111_v6  ;;  %v215_v26 = vpop.f32.mrb[3].mxu0  ;;  %v283_v27 = vmax.f32 %v263_v16, 0.0  ;;  %v267_v29 = vadd.f32 %v266_v24, %v119_v7  ;;  %v268_v31 = vpop.f32.mrb[3].mxu1 }
 0x139   :  { %v282_v28 = vmax.f32 %v212_v17, 0.0  ;;  %v216_v30 = vadd.f32 %v215_v26, %v115_v9  ;;  %v284_v32 = vmax.f32 %v265_v21, 0.0  ;;  %v269_v34 = vadd.f32 %v268_v31, %v123_v10 }
 0x13a   :  { %v285_v33 = vmax.f32 %v214_v22, 0.0  ;;  %v287_v35 = vmax.f32 %v267_v29, 0.0  ;;  %v298_v37 = vmul.f32 %v2166_v15, %v281_v20  ;;  %v300_v41 = vmul.f32 %v2166_v15, %v283_v27 }
 0x13b   :  { %v286_v36 = vmax.f32 %v216_v30, 0.0  ;;  %v288_v40 = vmax.f32 %v269_v34, 0.0  ;;  %v299_v42 = vmul.f32 %v2166_v15, %v282_v28  ;;  %v301_v46 = vmul.f32 %v2166_v15, %v284_v32 }
 0x13c   :  { %v303_v39 = vmul.f32 %v2169_v23, %v285_v33  ;;  %v305_v43 = vmul.f32 %v2169_v23, %v287_v35  ;;  %v2188_v27 = vrot.slane %v355_v63, %v2149_v1  ;;  %v2191_v30 = vrot.slane %v355_v63, %v2153_v3 }
 0x13d   :  { %v304_v44 = vmul.f32 %v2169_v23, %v286_v36  ;;  %v219_v45 = vpop.f32.mrb[4].mxu0  ;;  %v306_v48 = vmul.f32 %v2169_v23, %v288_v40  ;;  %v272_v50 = vpop.f32.mrb[4].mxu1  ;;  %v2199_v32 = vrot.slane %v355_v63, %v2157_v5 }
 0x13e   :  { %v2178_v47 = vadd.f32 %v303_v39, %v298_v37  ;;  %v220_v49 = vadd.f32 %v219_v45, %v111_v6  ;;  %v221_v51 = vpop.f32.mrb[5].mxu0  ;;  %v2181_v52 = vadd.f32 %v305_v43, %v300_v41  ;;  %v273_v53 = vadd.f32 %v272_v50, %v119_v7  ;;  %v274_v58 = vpop.f32.mrb[5].mxu1 }
 0x13f   :  { %v222_v54 = vadd.f32 %v221_v51, %v115_v9  ;;  %v223_v61 = vpop.f32.mrb[6].mxu0  ;;  %v2183_v0 = vadd.f32 %v304_v44, %v299_v42  ;;  %v275_v11 = vadd.f32 %v274_v58, %v123_v10  ;;  %v276_v13 = vpop.f32.mrb[6].mxu1  ;;  %v2185_v16 = vadd.f32 %v306_v48, %v301_v46 }
 0x140   :  { %v289_v2 = vmax.f32 %v220_v49, 0.0  ;;  %v224_v12 = vadd.f32 %v223_v61, %v111_v6  ;;  %v225_v14 = vpop.f32.mrb[7].mxu0  ;;  %v291_v17 = vmax.f32 %v273_v53, 0.0  ;;  %v277_v19 = vadd.f32 %v276_v13, %v119_v7  ;;  %v278_v21 = vpop.f32.mrb[7].mxu1 }
 0x141   :  { %v290_v18 = vmax.f32 %v222_v54, 0.0  ;;  %v226_v20 = vadd.f32 %v225_v14, %v115_v9  ;;  %v292_v22 = vmax.f32 %v275_v11, 0.0  ;;  %v279_v26 = vadd.f32 %v278_v21, %v123_v10 }
 0x142   :  { %v293_v24 = vmax.f32 %v224_v12, 0.0  ;;  %v295_v28 = vmax.f32 %v277_v19, 0.0  ;;  %v2194_v6 = vrot.slane %v355_v63, %v2155_v4  ;;  %v311_v31 = vmul.f32 %v2166_v15, %v289_v2  ;;  %v2218_v63 = vld [vmem:[#allocation10 + $0x80] sm:$0xff]  ;;  %v2226_v19 = vld [vmem:[#allocation10 + $0x88] sm:$0xff] }
 0x143   :  { %v294_v29 = vmax.f32 %v226_v20, 0.0  ;;  %v296_v9 = vmax.f32 %v279_v26, 0.0  ;;  %v313_v10 = vmul.f32 %v2166_v15, %v291_v17  ;;  %v312_v33 = vmul.f32 %v2166_v15, %v290_v18  ;;  %v2220_v2 = vld [vmem:[#allocation10 + $0xc0] sm:$0xff]  ;;  %v2228_v20 = vld [vmem:[#allocation10 + $0xc8] sm:$0xff] }
 0x144   :  { %v315_v7 = vmul.f32 %v2169_v23, %v293_v24  ;;  %v317_v34 = vmul.f32 %v2169_v23, %v295_v28  ;;  %v314_v37 = vmul.f32 %v2166_v15, %v292_v22  ;;  %v1832_v59 = vcombine.low %v2226_v19, %v2228_v20 }
 0x145   :  { %v316_v35 = vmul.f32 %v2169_v23, %v294_v29  ;;  %v451_v36 = vpop.f32.mrb[8].mxu0  ;;  %v318_v39 = vmul.f32 %v2169_v23, %v296_v9  ;;  %v504_v41 = vpop.f32.mrb[8].mxu1  ;;  %v1827_v29 = vcombine.high %v2218_v63, %v2220_v2 }
 0x146   :  { %v452_v40 = vadd.f32 %v451_v36, %v2188_v27  ;;  %v453_v42 = vpop.f32.mrb[9].mxu0  ;;  %v2208_v43 = vadd.f32 %v315_v7, %v311_v31  ;;  %v505_v44 = vadd.f32 %v504_v41, %v2191_v30  ;;  %v506_v46 = vpop.f32.mrb[9].mxu1  ;;  %v2214_v50 = vadd.f32 %v317_v34, %v313_v10 }
 0x147   :  { %v454_v45 = vadd.f32 %v453_v42, %v2194_v6  ;;  %v455_v48 = vpop.f32.mrb[10].mxu0  ;;  %v2212_v49 = vadd.f32 %v316_v35, %v312_v33  ;;  %v507_v53 = vadd.f32 %v506_v46, %v2199_v32  ;;  %v508_v58 = vpop.f32.mrb[10].mxu1  ;;  %v2222_v11 = vadd.f32 %v318_v39, %v314_v37 }
 0x148   :  { %v523_v51 = vmax.f32 %v452_v40, 0.0  ;;  %v456_v54 = vadd.f32 %v455_v48, %v2188_v27  ;;  %v457_v61 = vpop.f32.mrb[11].mxu0  ;;  %v525_v12 = vmax.f32 %v505_v44, 0.0  ;;  %v509_v14 = vadd.f32 %v508_v58, %v2191_v30  ;;  %v510_v18 = vpop.f32.mrb[11].mxu1 }
 0x149   :  { %v524_v13 = vmax.f32 %v454_v45, 0.0  ;;  %v458_v17 = vadd.f32 %v457_v61, %v2194_v6  ;;  %v526_v21 = vmax.f32 %v507_v53, 0.0  ;;  %v511_v24 = vadd.f32 %v510_v18, %v2199_v32 }
 0x14a   :  { %v527_v22 = vmax.f32 %v456_v54, 0.0  ;;  %v529_v26 = vmax.f32 %v509_v14, 0.0  ;;  %v539_v31 = vmul.f32 %v523_v51, %v2166_v15  ;;  %v1831_v10 = vcombine.high %v2226_v19, %v2228_v20 }
 0x14b   :  { %v528_v28 = vmax.f32 %v458_v17, 0.0  ;;  %v530_v9 = vmax.f32 %v511_v24, 0.0  ;;  %v541_v33 = vmul.f32 %v525_v12, %v2166_v15  ;;  %v540_v34 = vmul.f32 %v524_v13, %v2166_v15 }
 0x14c   :  { %v543_v7 = vmul.f32 %v527_v22, %v2169_v23  ;;  %v545_v35 = vmul.f32 %v529_v26, %v2169_v23  ;;  %v542_v39 = vmul.f32 %v526_v21, %v2166_v15 }
 0x14d   :  { %v544_v36 = vmul.f32 %v528_v28, %v2169_v23  ;;  %v461_v37 = vpop.f32.mrb[12].mxu0  ;;  %v546_v41 = vmul.f32 %v530_v9, %v2169_v23  ;;  %v514_v44 = vpop.f32.mrb[12].mxu1 }
 0x14e   :  { %v547_v40 = vadd.f32 %v543_v7, %v539_v31  ;;  %v462_v42 = vadd.f32 %v461_v37, %v2188_v27  ;;  %v463_v45 = vpop.f32.mrb[13].mxu0  ;;  %v549_v46 = vadd.f32 %v545_v35, %v541_v33  ;;  %v515_v48 = vadd.f32 %v514_v44, %v2191_v30  ;;  %v516_v53 = vpop.f32.mrb[13].mxu1 }
 0x14f   :  { %v464_v51 = vadd.f32 %v463_v45, %v2194_v6  ;;  %v465_v54 = vpop.f32.mrb[14].mxu0  ;;  %v548_v58 = vadd.f32 %v544_v36, %v540_v34  ;;  %v517_v12 = vadd.f32 %v516_v53, %v2199_v32  ;;  %v518_v14 = vpop.f32.mrb[14].mxu1  ;;  %v550_v18 = vadd.f32 %v546_v41, %v542_v39  ;;  %v888_v45 = vld [vmem:[#allocation7 + $0x28] sm:$0xff] }
 0x150   :  { %v531_v61 = vmax.f32 %v462_v42, 0.0  ;;  %v466_v13 = vadd.f32 %v465_v54, %v2188_v27  ;;  %v467_v17 = vpop.f32.mrb[15].mxu0  ;;  %v533_v21 = vmax.f32 %v515_v48, 0.0  ;;  %v519_v24 = vadd.f32 %v518_v14, %v2191_v30  ;;  %v520_v28 = vpop.f32.mrb[15].mxu1  ;;  %v894_v48 = vld [vmem:[#allocation7 + $0xe8] sm:$0xff] }
 0x151   :  { %v532_v22 = vmax.f32 %v464_v51, 0.0  ;;  %v468_v26 = vadd.f32 %v467_v17, %v2194_v6  ;;  %651 = vmatprep.mubr.f32.mxu0 %v548_v58  ;;  %v534_v7 = vmax.f32 %v517_v12, 0.0  ;;  %v521_v33 = vadd.f32 %v520_v28, %v2199_v32  ;;  %726 = vmatprep.mubr.f32.mxu1 %v550_v18  ;;  %v1109_v12 = vld [vmem:[#allocation10 + $0xe0] sm:$0xff]  ;;  %v1110_v17 = vld [vmem:[#allocation10 + $0xe8] sm:$0xff] }
 0x152   :  { %v551_v31 = vmul.f32 %v531_v61, %v2166_v15  ;;  %v535_v9 = vmax.f32 %v466_v13, 0.0  ;;  %652 = vmatmul.mubr.f32.vlgmr.msra.gmra.mrb[16].mxu0 %v547_v40  ;;  %v553_v27 = vmul.f32 %v533_v21, %v2166_v15  ;;  %v537_v35 = vmax.f32 %v519_v24, 0.0  ;;  %727 = vmatmul.mubr.f32.vlgmr.msra.gmra.mrb[16].mxu1 %v549_v46  ;;  %v890_v46 = vld [vmem:[#allocation7 + $0x68] sm:$0xff]  ;;  %v1107_v61 = vld [vmem:[#allocation10 + $0xa0] sm:$0xff]  ;;  %v1108_v13 = vld [vmem:[#allocation10 + $0xa8] sm:$0xff] }
 0x153   :  { %v552_v34 = vmul.f32 %v532_v22, %v2166_v15  ;;  %v536_v36 = vmax.f32 %v468_v26, 0.0  ;;  %1772 = vmatpush1.bf16.xpose.msra.mxu0 %v1826_v60  ;;  %v554_v30 = vmul.f32 %v534_v7, %v2166_v15  ;;  %v538_v37 = vmax.f32 %v521_v33, 0.0  ;;  %1780 = vmatpush1.bf16.xpose.msra.mxu1 %v1830_v62  ;;  %v2289_v24 = vld [vmem:[#allocation7 + $0x30] sm:$0xff]  ;;  %v2293_v28 = vld [vmem:[#allocation7 + $0x38] sm:$0xff] }
 0x154   :  { %v555_v6 = vmul.f32 %v535_v9, %v2169_v23  ;;  %1774 = vmatprep.subr.bf16.mxu0 %v1827_v29  ;;  %v557_v32 = vmul.f32 %v537_v35, %v2169_v23  ;;  %1782 = vmatprep.subr.bf16.mxu1 %v1831_v10  ;;  %v1828_v42 = vcombine.low %v2218_v63, %v2220_v2  ;;  %v891_v63 = vld [vmem:[#allocation7 + $0xa0] sm:$0xff]  ;;  %v892_v10 = vld [vmem:[#allocation7 + $0xa8] sm:$0xff]  ;;  %v2291_v26 = vld [vmem:[#allocation7 + $0x70] sm:$0xff] }
 0x155   :  { %v556_v39 = vmul.f32 %v536_v36, %v2169_v23  ;;  %v558_v40 = vmul.f32 %v538_v37, %v2169_v23  ;;  %v1730_v62 = vcombine.high %v887_v55, %v889_v56  ;;  %v1732_v29 = vcombine.high %v888_v45, %v890_v46  ;;  %v893_v2 = vld [vmem:[#allocation7 + $0xe0] sm:$0xff]  ;;  %v2297_v7 = vld [vmem:[#allocation7 + $0x78] sm:$0xff] }
 0x156   :  { %v559_v41 = vadd.f32 %v555_v6, %v551_v31  ;;  %v561_v44 = vadd.f32 %v557_v32, %v553_v27  ;;  %v1729_v51 = vcombine.low %v887_v55, %v889_v56  ;;  %v1731_v19 = vcombine.low %v888_v45, %v890_v46  ;;  %v895_v46 = vld [vmem:[#allocation9 + $0x8] sm:$0xf] }
 0x157   :  { %v560_v60 = vadd.f32 %v556_v39, %v552_v34  ;;  %v562_v57 = vadd.f32 %v558_v40, %v554_v30  ;;  %v1734_v20 = vcombine.high %v891_v63, %v893_v2  ;;  %v1736_v53 = vcombine.high %v892_v10, %v894_v48 }
 0x158   :  { %v1835_v14 = vcombine.high %v1107_v61, %v1109_v12  ;;  %v1836_v18 = vcombine.low %v1107_v61, %v1109_v12  ;;  %v1839_v21 = vcombine.high %v1108_v13, %v1110_v17  ;;  %v1840_v22 = vcombine.low %v1108_v13, %v1110_v17  ;;  %v2316_v12 = vld [vmem:[#allocation7 + $0xb0] sm:$0xff] }
 0x159   :  { %656 = vmatprep.mubr.f32.mxu0 %v560_v60  ;;  %731 = vmatprep.mubr.f32.mxu1 %v562_v57  ;;  %v1742_v31 = vcombine.high %v2289_v24, %v2291_v26  ;;  %v1741_v9 = vcombine.low %v2289_v24, %v2291_v26  ;;  %v1743_v33 = vcombine.low %v2293_v28, %v2297_v7  ;;  %v2318_v13 = vld [vmem:[#allocation7 + $0xf0] sm:$0xff] }
 0x15a   :  { %657 = vmatmul.mubr.f32.gmra.mrb[18].mxu0 %v559_v41  ;;  %732 = vmatmul.mubr.f32.gmra.mrb[18].mxu1 %v561_v44  ;;  %v1744_v27 = vcombine.high %v2293_v28, %v2297_v7 }
 0x15b   :  { %1776 = vmatpush1.bf16.xpose.msra.mxu0 %v1828_v42  ;;  %1784 = vmatpush1.bf16.xpose.msra.mxu1 %v1832_v59 }
 0x15c   :  { %801 = vmatprep.mubr.f32.mxu0 %v2183_v0  ;;  %876 = vmatprep.mubr.f32.mxu1 %v2185_v16  ;;  %v1733_v0 = vcombine.low %v891_v63, %v893_v2  ;;  %v1735_v16 = vcombine.low %v892_v10, %v894_v48  ;;  %v900_v2 = vrot.slane %v895_v46, %v2149_v1 }
 0x15d   :  { %957 = vmatprep.subr.bf16.mxu0 %v1730_v62  ;;  %1010 = vmatprep.subr.bf16.mxu1 %v1732_v29  ;;  %v908_v48 = vrot.slane %v895_v46, %v2153_v3 }
 0x162   :  { %802 = vmatmul.mubr.f32.vlgmr.msra.gmra.mrb[20].mxu0 %v2178_v47  ;;  %877 = vmatmul.mubr.f32.vlgmr.msra.gmra.mrb[20].mxu1 %v2181_v52  ;;  %v1103_v47 = vld [vmem:[#allocation10 + $0x20] sm:$0xff] }
 0x163   :  { %806 = vmatprep.mubr.f32.mxu0 %v2212_v49  ;;  %881 = vmatprep.mubr.f32.mxu1 %v2222_v11  ;;  %v1105_v52 = vld [vmem:[#allocation10 + $0x60] sm:$0xff] }
 0x164   :  { %958 = vmatpush1.bf16.msra.mxu0 %v1729_v51  ;;  %1011 = vmatpush1.bf16.msra.mxu1 %v1731_v19  ;;  %v1833_v49 = vcombine.high %v1103_v47, %v1105_v52  ;;  %v1834_v11 = vcombine.low %v1103_v47, %v1105_v52  ;;  %v904_v51 = vrot.slane %v895_v46, %v2155_v4 }
 0x165   :  { %959 = vmatprep.subr.bf16.mxu0 %v1734_v20  ;;  %1012 = vmatprep.subr.bf16.mxu1 %v1736_v53  ;;  %v2313_v19 = vrot.slane %v895_v46, %v2157_v5 }
 0x166   :  { %807 = vmatmul.mubr.f32.gmra.mrb[22].mxu0 %v2208_v43  ;;  %882 = vmatmul.mubr.f32.gmra.mrb[22].mxu1 %v2214_v50  ;;  %v1104_v43 = vld [vmem:[#allocation10 + $0x28] sm:$0xff] }
 0x167   :  { %989 = vmatprep.mubr.bf16.mxu0 %v1999_v8  ;;  %1042 = vmatprep.mubr.bf16.mxu1 %v1999_v8  ;;  %v1106_v50 = vld [vmem:[#allocation10 + $0x68] sm:$0xff] }
 0x168   :  { %960 = vmatpush1.bf16.msra.mxu0 %v1733_v0  ;;  %1013 = vmatpush1.bf16.msra.mxu1 %v1735_v16  ;;  %v1837_v54 = vcombine.high %v1104_v43, %v1106_v50  ;;  %v1838_v58 = vcombine.low %v1104_v43, %v1106_v50 }
 0x169   :  { %1786 = vmatprep.subr.bf16.mxu0 %v1833_v49 }
 0x16a   :  { %1794 = vmatprep.subr.bf16.mxu1 %v1837_v54 }
 0x16b   :  { %1737 = vmatmul.mubr.msk.bf16.vlgmr.msra.gmra.mrb[24].mxu0 %vm168_vm0, %v2107_v25  ;;  %1739 = vmatmul.mubr.msk.bf16.vlgmr.msra.gmra.mrb[24].mxu1 %vm168_vm0, %v2107_v25 }
 0x16c   :  { %999 = vmatprep.mubr.bf16.mxu0 %v1999_v8  ;;  %1052 = vmatprep.mubr.bf16.mxu1 %v1999_v8 }
 0x171   :  { %1788 = vmatpush1.bf16.xpose.msra.mxu0 %v1834_v11  ;;  %1796 = vmatpush1.bf16.xpose.msra.mxu1 %v1838_v58 }
 0x172   :  { %1790 = vmatprep.subr.bf16.mxu0 %v1835_v14  ;;  %1798 = vmatprep.subr.bf16.mxu1 %v1839_v21 }
 0x173   :  { %1738 = vmatmul.mubr.msk.bf16.gmra.mrb[28].mxu0 %vm168_vm0, %v2115_v38  ;;  %1740 = vmatmul.mubr.msk.bf16.gmra.mrb[28].mxu1 %vm168_vm0, %v2115_v38 }
 0x179   :  { %1792 = vmatpush1.bf16.xpose.msra.mxu0 %v1836_v18  ;;  %1800 = vmatpush1.bf16.xpose.msra.mxu1 %v1840_v22 }
 0x17a   :  { %1349 = vmatprep.subr.bf16.mxu0 %v1742_v31  ;;  %1402 = vmatprep.subr.bf16.mxu1 %v1744_v27  ;;  %v2320_v31 = vld [vmem:[#allocation7 + $0xb8] sm:$0xff] }
 0x17b   :  { %v2322_v27 = vld [vmem:[#allocation7 + $0xf8] sm:$0xff] }
 0x225   :  { %v653_v34 = vpop.f32.mrb[16].mxu0  ;;  %v728_v35 = vpop.f32.mrb[16].mxu1 }
 0x226   :  { %v655_v36 = vpop.f32.mrb[17].mxu0  ;;  %v729_v30 = vadd.f32 %v728_v35, %v653_v34  ;;  %v730_v6 = vpop.f32.mrb[17].mxu1 }
 0x22d   :  { %v658_v37 = vpop.f32.mrb[18].mxu0  ;;  %v733_v32 = vpop.f32.mrb[18].mxu1 }
 0x22e   :  { %v660_v39 = vpop.f32.mrb[19].mxu0  ;;  %v734_v40 = vadd.f32 %v733_v32, %v658_v37  ;;  %v735_v41 = vpop.f32.mrb[19].mxu1  ;;  %v1746_v37 = vcombine.high %v2316_v12, %v2318_v13 }
 0x22f   :  { %v1748_v41 = vcombine.high %v2320_v31, %v2322_v27 }
 0x235   :  { %v803_v55 = vpop.f32.mrb[20].mxu0  ;;  %v878_v60 = vpop.f32.mrb[20].mxu1 }
 0x236   :  { %v804_v56 = vadd.f32 %v803_v55, %v729_v30  ;;  %v805_v42 = vpop.f32.mrb[21].mxu0  ;;  %v880_v44 = vpop.f32.mrb[21].mxu1 }
 0x238   :  { %v2305_v45 = vadd.f32 %v878_v60, %v804_v56 }
 0x239   :  { %v808_v57 = vpop.f32.mrb[22].mxu0  ;;  %v883_v62 = vpop.f32.mrb[22].mxu1 }
 0x23a   :  { %v809_v59 = vadd.f32 %v808_v57, %v734_v40  ;;  %v810_v29 = vpop.f32.mrb[23].mxu0  ;;  %v885_v63 = vpop.f32.mrb[23].mxu1 }
 0x23c   :  { %v2308_v10 = vadd.f32 %v883_v62, %v809_v59 }
 0x23e   :  { %v991_v20 = vpop.f32.mrb[24].mxu0  ;;  %v1044_v0 = vpop.f32.mrb[24].mxu1 }
 0x23f   :  { %v992_v53 = vadd.f32 %v991_v20, %v900_v2  ;;  %v993_v16 = vpop.f32.mrb[25].mxu0  ;;  %v1045_v47 = vadd.f32 %v1044_v0, %v908_v48  ;;  %v1046_v43 = vpop.f32.mrb[25].mxu1 }
 0x240   :  { %v994_v52 = vadd.f32 %v993_v16, %v904_v51  ;;  %v995_v49 = vpop.f32.mrb[26].mxu0  ;;  %v1047_v11 = vadd.f32 %v1046_v43, %v2313_v19  ;;  %v1048_v58 = vpop.f32.mrb[26].mxu1 }
 0x241   :  { %v1063_v50 = vmax.f32 %v992_v53, 0.0  ;;  %v996_v54 = vadd.f32 %v995_v49, %v900_v2  ;;  %v997_v61 = vpop.f32.mrb[27].mxu0  ;;  %v1065_v14 = vmax.f32 %v1045_v47, 0.0  ;;  %v1049_v18 = vadd.f32 %v1048_v58, %v908_v48  ;;  %v1050_v22 = vpop.f32.mrb[27].mxu1 }
 0x242   :  { %v1064_v17 = vmax.f32 %v994_v52, 0.0  ;;  %v998_v21 = vadd.f32 %v997_v61, %v904_v51  ;;  %v1066_v34 = vmax.f32 %v1047_v11, 0.0  ;;  %v1051_v36 = vadd.f32 %v1050_v22, %v2313_v19 }
 0x243   :  { %v1067_v35 = vmax.f32 %v996_v54, 0.0  ;;  %v1069_v30 = vmax.f32 %v1049_v18, 0.0  ;;  %v1079_v32 = vmul.f32 %v1063_v50, %v2166_v15  ;;  %v1081_v55 = vmul.f32 %v1065_v14, %v2166_v15 }
 0x244   :  { %v1068_v6 = vmax.f32 %v998_v21, 0.0  ;;  %v1070_v40 = vmax.f32 %v1051_v36, 0.0  ;;  %v1080_v56 = vmul.f32 %v1064_v17, %v2166_v15  ;;  %v1082_v46 = vmul.f32 %v1066_v34, %v2166_v15 }
 0x245   :  { %v1083_v39 = vmul.f32 %v1067_v35, %v2169_v23  ;;  %v1085_v60 = vmul.f32 %v1069_v30, %v2169_v23 }
 0x246   :  { %v1084_v42 = vmul.f32 %v1068_v6, %v2169_v23  ;;  %v1001_v44 = vpop.f32.mrb[28].mxu0  ;;  %v1086_v59 = vmul.f32 %v1070_v40, %v2169_v23  ;;  %v1054_v29 = vpop.f32.mrb[28].mxu1 }
 0x247   :  { %v1087_v57 = vadd.f32 %v1083_v39, %v1079_v32  ;;  %v1002_v62 = vadd.f32 %v1001_v44, %v900_v2  ;;  %v1003_v63 = vpop.f32.mrb[29].mxu0  ;;  %v1089_v20 = vadd.f32 %v1085_v60, %v1081_v55  ;;  %v1055_v53 = vadd.f32 %v1054_v29, %v908_v48  ;;  %v1056_v16 = vpop.f32.mrb[29].mxu1 }
 0x248   :  { %v1004_v0 = vadd.f32 %v1003_v63, %v904_v51  ;;  %v1005_v47 = vpop.f32.mrb[30].mxu0  ;;  %v1088_v52 = vadd.f32 %v1084_v42, %v1080_v56  ;;  %v1057_v49 = vadd.f32 %v1056_v16, %v2313_v19  ;;  %v1058_v11 = vpop.f32.mrb[30].mxu1  ;;  %v1090_v58 = vadd.f32 %v1086_v59, %v1082_v46  ;;  %v1500_v42 = vld [vmem:[#allocation10 + $0xb8] sm:$0xff] }
 0x249   :  { %v1071_v43 = vmax.f32 %v1002_v62, 0.0  ;;  %v1006_v50 = vadd.f32 %v1005_v47, %v900_v2  ;;  %v1007_v54 = vpop.f32.mrb[31].mxu0  ;;  %v1073_v61 = vmax.f32 %v1055_v53, 0.0  ;;  %v1059_v17 = vadd.f32 %v1058_v11, %v908_v48  ;;  %v1060_v21 = vpop.f32.mrb[31].mxu1  ;;  %v1502_v46 = vld [vmem:[#allocation10 + $0xf8] sm:$0xff] }
 0x24a   :  { %v1072_v14 = vmax.f32 %v1004_v0, 0.0  ;;  %v1008_v18 = vadd.f32 %v1007_v54, %v904_v51  ;;  %1191 = vmatprep.mubr.f32.mxu0 %v1088_v52  ;;  %v1074_v22 = vmax.f32 %v1057_v49, 0.0  ;;  %v1061_v35 = vadd.f32 %v1060_v21, %v2313_v19  ;;  %1266 = vmatprep.mubr.f32.mxu1 %v1090_v58  ;;  %v1287_v16 = vld [vmem:[#allocation9 + $0xc] sm:$0xf] }
 0x24b   :  { %v1075_v34 = vmax.f32 %v1006_v50, 0.0  ;;  %1192 = vmatmul.mubr.f32.vlgmr.msra.gmra.mrb[32].mxu0 %v1087_v57  ;;  %v1077_v36 = vmax.f32 %v1059_v17, 0.0  ;;  %1267 = vmatmul.mubr.f32.vlgmr.msra.gmra.mrb[32].mxu1 %v1089_v20  ;;  %v1745_v2 = vcombine.low %v2316_v12, %v2318_v13  ;;  %v1091_v48 = vmul.f32 %v1071_v43, %v2166_v15 }
 0x24c   :  { %v1076_v30 = vmax.f32 %v1008_v18, 0.0  ;;  %1350 = vmatpush1.bf16.msra.mxu0 %v1741_v9  ;;  %v1078_v6 = vmax.f32 %v1061_v35, 0.0  ;;  %1403 = vmatpush1.bf16.msra.mxu1 %v1743_v33  ;;  %v1747_v19 = vcombine.low %v2320_v31, %v2322_v27  ;;  %v1093_v32 = vmul.f32 %v1073_v61, %v2166_v15  ;;  %v1495_v31 = vld [vmem:[#allocation10 + $0x30] sm:$0xff] }
 0x24d   :  { %v1095_v51 = vmul.f32 %v1075_v34, %v2169_v23  ;;  %1351 = vmatprep.subr.bf16.mxu0 %v1746_v37  ;;  %v1092_v24 = vmul.f32 %v1072_v14, %v2166_v15  ;;  %v1097_v26 = vmul.f32 %v1077_v36, %v2169_v23  ;;  %1404 = vmatprep.subr.bf16.mxu1 %v1748_v41  ;;  %v1497_v27 = vld [vmem:[#allocation10 + $0x70] sm:$0xff]  ;;  %v1496_v37 = vld [vmem:[#allocation10 + $0x38] sm:$0xff] }
 0x24e   :  { %v1096_v9 = vmul.f32 %v1076_v30, %v2169_v23  ;;  %v1094_v12 = vmul.f32 %v1074_v22, %v2166_v15  ;;  %v1098_v13 = vmul.f32 %v1078_v6, %v2169_v23  ;;  %v1841_v40 = vcombine.high %v1495_v31, %v1497_v27  ;;  %v1498_v41 = vld [vmem:[#allocation10 + $0x78] sm:$0xff] }
 0x24f   :  { %v1099_v39 = vadd.f32 %v1095_v51, %v1091_v48  ;;  %v1101_v7 = vadd.f32 %v1097_v26, %v1093_v32  ;;  %v1842_v55 = vcombine.low %v1495_v31, %v1497_v27  ;;  %v1845_v56 = vcombine.high %v1496_v37, %v1498_v41 }
 0x250   :  { %v1100_v28 = vadd.f32 %v1096_v9, %v1092_v24  ;;  %1352 = vmatpush1.bf16.msra.mxu0 %v1745_v2  ;;  %v1102_v33 = vadd.f32 %v1098_v13, %v1094_v12  ;;  %1405 = vmatpush1.bf16.msra.mxu1 %v1747_v19  ;;  %v1846_v60 = vcombine.low %v1496_v37, %v1498_v41 }
 0x251   :  { %1802 = vmatprep.subr.bf16.mxu0 %v1841_v40  ;;  %1810 = vmatprep.subr.bf16.mxu1 %v1845_v56  ;;  %v1847_v59 = vcombine.high %v1500_v42, %v1502_v46  ;;  %v1292_v49 = vrot.slane %v1287_v16, %v2149_v1  ;;  %v1300_v54 = vrot.slane %v1287_v16, %v2153_v3 }
 0x252   :  { %1196 = vmatprep.mubr.f32.mxu0 %v1100_v28  ;;  %1271 = vmatprep.mubr.f32.mxu1 %v1102_v33  ;;  %v1296_v58 = vrot.slane %v1287_v16, %v2155_v4  ;;  %v1304_v61 = vrot.slane %v1287_v16, %v2157_v5 }
 0x253   :  { %1197 = vmatmul.mubr.f32.gmra.mrb[34].mxu0 %v1099_v39  ;;  %1272 = vmatmul.mubr.f32.gmra.mrb[34].mxu1 %v1101_v7 }
 0x254   :  { %1381 = vmatprep.mubr.bf16.mxu0 %v1999_v8  ;;  %1434 = vmatprep.mubr.bf16.mxu1 %v1999_v8 }
 0x257   :  { %1749 = vmatmul.mubr.msk.bf16.vlgmr.msra.gmra.mrb[36].mxu0 %vm168_vm0, %v2107_v25  ;;  %1751 = vmatmul.mubr.msk.bf16.vlgmr.msra.gmra.mrb[36].mxu1 %vm168_vm0, %v2107_v25  ;;  %v1499_v25 = vld [vmem:[#allocation10 + $0xb0] sm:$0xff] }
 0x258   :  { %1391 = vmatprep.mubr.bf16.mxu0 %v1999_v8  ;;  %1444 = vmatprep.mubr.bf16.mxu1 %v1999_v8  ;;  %v1501_v8 = vld [vmem:[#allocation10 + $0xf0] sm:$0xff] }
 0x259   :  { %1804 = vmatpush1.bf16.xpose.msra.mxu0 %v1842_v55  ;;  %1812 = vmatpush1.bf16.xpose.msra.mxu1 %v1846_v60  ;;  %v1843_v44 = vcombine.high %v1499_v25, %v1501_v8  ;;  %v1844_v57 = vcombine.low %v1499_v25, %v1501_v8 }
 0x25a   :  { %1814 = vmatprep.subr.bf16.mxu1 %v1847_v59 }
 0x25b   :  { %1806 = vmatprep.subr.bf16.mxu0 %v1843_v44 }
 0x25f   :  { %1750 = vmatmul.mubr.msk.bf16.gmra.mrb[40].mxu0 %vm168_vm0, %v2115_v38  ;;  %1752 = vmatmul.mubr.msk.bf16.gmra.mrb[40].mxu1 %vm168_vm0, %v2115_v38  ;;  %v1848_v38 = vcombine.low %v1500_v42, %v1502_v46 }
 0x261   :  { %1808 = vmatpush1.bf16.xpose.msra.mxu0 %v1844_v57  ;;  %1816 = vmatpush1.bf16.xpose.msra.mxu1 %v1848_v38 }
 0x31e   :  { %v1193_v62 = vpop.f32.mrb[32].mxu0  ;;  %v1268_v29 = vpop.f32.mrb[32].mxu1 }
 0x31f   :  { %v1195_v63 = vpop.f32.mrb[33].mxu0  ;;  %v1269_v20 = vadd.f32 %v1268_v29, %v1193_v62  ;;  %v1270_v53 = vpop.f32.mrb[33].mxu1 }
 0x321   :  { %v2370_v0 = vadd.f32 %v1269_v20, %v2305_v45 }
 0x326   :  { %v1198_v47 = vpop.f32.mrb[34].mxu0  ;;  %v1273_v52 = vpop.f32.mrb[34].mxu1 }
 0x327   :  { %v1200_v43 = vpop.f32.mrb[35].mxu0  ;;  %v1274_v50 = vadd.f32 %v1273_v52, %v1198_v47  ;;  %v1275_v11 = vpop.f32.mrb[35].mxu1 }
 0x329   :  { %v2377_v14 = vadd.f32 %v1274_v50, %v2308_v10 }
 0x32a   :  { %v1383_v17 = vpop.f32.mrb[36].mxu0  ;;  %v1436_v18 = vpop.f32.mrb[36].mxu1 }
 0x32b   :  { %v1384_v45 = vadd.f32 %v1383_v17, %v1292_v49  ;;  %v1385_v21 = vpop.f32.mrb[37].mxu0  ;;  %v1437_v22 = vadd.f32 %v1436_v18, %v1300_v54  ;;  %v1438_v35 = vpop.f32.mrb[37].mxu1 }
 0x32c   :  { %v1386_v34 = vadd.f32 %v1385_v21, %v1296_v58  ;;  %v1387_v36 = vpop.f32.mrb[38].mxu0  ;;  %v1439_v2 = vadd.f32 %v1438_v35, %v1304_v61  ;;  %v1440_v51 = vpop.f32.mrb[38].mxu1 }
 0x32d   :  { %v1455_v30 = vmax.f32 %v1384_v45, 0.0  ;;  %v1388_v48 = vadd.f32 %v1387_v36, %v1292_v49  ;;  %v1389_v3 = vpop.f32.mrb[39].mxu0  ;;  %v1457_v6 = vmax.f32 %v1437_v22, 0.0  ;;  %v1441_v19 = vadd.f32 %v1440_v51, %v1300_v54  ;;  %v1442_v32 = vpop.f32.mrb[39].mxu1 }
 0x32e   :  { %v1456_v4 = vmax.f32 %v1386_v34, 0.0  ;;  %v1390_v5 = vadd.f32 %v1389_v3, %v1296_v58  ;;  %v1458_v10 = vmax.f32 %v1439_v2, 0.0  ;;  %v1443_v26 = vadd.f32 %v1442_v32, %v1304_v61 }
 0x32f   :  { %v1459_v24 = vmax.f32 %v1388_v48, 0.0  ;;  %v1461_v9 = vmax.f32 %v1441_v19, 0.0  ;;  %v1471_v13 = vmul.f32 %v1455_v30, %v2166_v15  ;;  %v1473_v7 = vmul.f32 %v1457_v6, %v2166_v15  ;;  %v1671_v6 = vld [vmem:[%s2425_s5] sm:$0x1]  ;;  %s2000_s5 = smov [#allocation12]  }
 0x330   :  { %v1460_v12 = vmax.f32 %v1390_v5, 0.0  ;;  %v1462_v28 = vmax.f32 %v1443_v26, 0.0  ;;  %v1472_v33 = vmul.f32 %v1456_v4, %v2166_v15  ;;  %v1474_v40 = vmul.f32 %v1458_v10, %v2166_v15  ;;  %s1689_s13 = sshll.u32 %s2000_s5, 4  ;;  %s1690_s13 = int_to_ptr.vmem [resolvable:$true] %s1689_s13 }
 0x331   :  { %v1475_v39 = vmul.f32 %v1459_v24, %v2169_v23  ;;  %v1477_v31 = vmul.f32 %v1461_v9, %v2169_v23  ;;  %v1672_v4 = vstv %s91_s8  ;;  %s1958_s14 = scalar_lea.vmem %s1690_s13, 256  ;;  %p1963_p8 = scmp.lt.s32.totalorder %s1690_s13, %s1690_s13 }
 0x332   :  { %v1476_v27 = vmul.f32 %v1460_v12, %v2169_v23  ;;  %v1393_v37 = vpop.f32.mrb[40].mxu0  ;;  %v1478_v55 = vmul.f32 %v1462_v28, %v2169_v23  ;;  %v1446_v60 = vpop.f32.mrb[40].mxu1  ;;  %v1673_v19 = vmul.f32 %v1672_v4, %v1671_v6  ;;  %p1959_p7 = scmp.ne.s32.totalorder %s1690_s13, %s1958_s14  ;;  %p1964_p9 = scmp.lt.s32.totalorder %s1958_s14, %s1958_s14 }
 0x333   :  { %v1479_v41 = vadd.f32 %v1475_v39, %v1471_v13  ;;  %v1394_v56 = vadd.f32 %v1393_v37, %v1292_v49  ;;  %v1395_v25 = vpop.f32.mrb[41].mxu0  ;;  %v1481_v8 = vadd.f32 %v1477_v31, %v1473_v7  ;;  %v1447_v42 = vadd.f32 %v1446_v60, %v1300_v54  ;;  %v1448_v46 = vpop.f32.mrb[41].mxu1 }
 0x334   :  { %v1396_v44 = vadd.f32 %v1395_v25, %v1296_v58  ;;  %v1397_v57 = vpop.f32.mrb[42].mxu0  ;;  %v1480_v59 = vadd.f32 %v1476_v27, %v1472_v33  ;;  %v1449_v62 = vadd.f32 %v1448_v46, %v1304_v61  ;;  %v1450_v63 = vpop.f32.mrb[42].mxu1  ;;  %v1482_v53 = vadd.f32 %v1478_v55, %v1474_v40  ;;  %p1965_p10 = por %p1964_p9, %p1963_p8 }
 0x335   :  { %v1463_v38 = vmax.f32 %v1394_v56, 0.0  ;;  %v1398_v29 = vadd.f32 %v1397_v57, %v1292_v49  ;;  %v1399_v20 = vpop.f32.mrb[43].mxu0  ;;  %v1465_v16 = vmax.f32 %v1447_v42, 0.0  ;;  %v1451_v52 = vadd.f32 %v1450_v63, %v1300_v54  ;;  %v1452_v50 = vpop.f32.mrb[43].mxu1 }
 0x336   :  { %v1464_v47 = vmax.f32 %v1396_v44, 0.0  ;;  %v1400_v43 = vadd.f32 %v1399_v20, %v1296_v58  ;;  %1583 = vmatprep.mubr.f32.mxu0 %v1480_v59  ;;  %v1466_v11 = vmax.f32 %v1449_v62, 0.0  ;;  %v1453_v45 = vadd.f32 %v1452_v50, %v1304_v61  ;;  %1658 = vmatprep.mubr.f32.mxu1 %v1482_v53  ;;  %p1966_p11 = pnand %p1965_p10, %p1959_p7 }
 0x337   :  { %v1467_v17 = vmax.f32 %v1398_v29, 0.0  ;;  %1584 = vmatmul.mubr.f32.vlgmr.msra.gmra.mrb[44].mxu0 %v1479_v41  ;;  %v1469_v18 = vmax.f32 %v1451_v52, 0.0  ;;  %1659 = vmatmul.mubr.f32.vlgmr.msra.gmra.mrb[44].mxu1 %v1481_v8  ;;  %v1483_v22 = vmul.f32 %v1463_v38, %v2166_v15  ;;  %v1485_v54 = vmul.f32 %v1465_v16, %v2166_v15 }
 0x338   :  { %v1468_v21 = vmax.f32 %v1400_v43, 0.0  ;;  %v1470_v34 = vmax.f32 %v1453_v45, 0.0  ;;  %v1484_v58 = vmul.f32 %v1464_v47, %v2166_v15  ;;  %v1486_v36 = vmul.f32 %v1466_v11, %v2166_v15 }
 0x339   :  { %v1487_v49 = vmul.f32 %v1467_v17, %v2169_v23  ;;  %v1489_v35 = vmul.f32 %v1469_v18, %v2169_v23  ;;  %v1678_v24 = vrot.slane %v1673_v19, %v2149_v1 }
 0x33a   :  { %v1488_v61 = vmul.f32 %v1468_v21, %v2169_v23  ;;  %v1490_v30 = vmul.f32 %v1470_v34, %v2169_v23 }
 0x33b   :  { %v1491_v2 = vadd.f32 %v1487_v49, %v1483_v22  ;;  %v1493_v51 = vadd.f32 %v1489_v35, %v1485_v54 }
 0x33c   :  { %v1492_v48 = vadd.f32 %v1488_v61, %v1484_v58  ;;  %v1494_v3 = vadd.f32 %v1490_v30, %v1486_v36 }
 0x33e   :  { %1588 = vmatprep.mubr.f32.mxu0 %v1492_v48  ;;  %1663 = vmatprep.mubr.f32.mxu1 %v1494_v3 }
 0x33f   :  { %1589 = vmatmul.mubr.f32.gmra.mrb[46].mxu0 %v1491_v2  ;;  %1664 = vmatmul.mubr.f32.gmra.mrb[46].mxu1 %v1493_v51 }
 0x40a   :  { %v1585_v5 = vpop.f32.mrb[44].mxu0  ;;  %v1660_v32 = vpop.f32.mrb[44].mxu1 }
 0x40b   :  { %v1587_v15 = vpop.f32.mrb[45].mxu0  ;;  %v1661_v10 = vadd.f32 %v1660_v32, %v1585_v5  ;;  %v1662_v23 = vpop.f32.mrb[45].mxu1 }
 0x40d   :  { %v1669_v26 = vadd.f32 %v1661_v10, %v2370_v0 }
 0x40f   :  { %v1680_v9 = vadd.f32 %v1678_v24, %v1669_v26 }
 0x411   :  { %1682 = vst.msk [vmem:[#allocation12] sm:$0xff] %vm168_vm0, %v1680_v9 }
 0x412   :  { %v1590_v12 = vpop.f32.mrb[46].mxu0  ;;  %v1665_v13 = vpop.f32.mrb[46].mxu1 }
 0x413   :  { %v1592_v39 = vpop.f32.mrb[47].mxu0  ;;  %v1666_v28 = vadd.f32 %v1665_v13, %v1590_v12  ;;  %v1667_v7 = vpop.f32.mrb[47].mxu1 }
 0x415   :  { %v1670_v33 = vadd.f32 %v1666_v28, %v2377_v14 }
 0x417   :  { %v1681_v31 = vadd.f32 %v1678_v24, %v1670_v33 }
 0x419   :  { %1683 = vst.msk [vmem:[#allocation12 + $0x8] sm:$0xff] %vm168_vm0, %v1681_v31 }
 0x41a   :  { %1969 = shalt.err (!%p1966_p11)
}
 0x41b   :  { %s1970_s17 = scalar_lea.hbm %s2426_s6, 256 }
 0x41c   :  { %p1971_p12 = scmp.ne.s32.totalorder %s2426_s6, %s1970_s17  ;;  %p1974_p13 = scmp.lt.u32.totalorder %s1970_s17, %s2426_s6 }
 0x41e   :  { %p1976_p0 = pnand %p1974_p13, %p1971_p12 }
 0x420   :  { %1979 = shalt.err (!%p1976_p0)
}
 0x421   :  { %1695 = dma.vmem_to_hbm [thread:$0]  %s1690_s13, 256, %s2426_s6, [#allocation4], %s1995_s0, %s1995_s0, %s1996_s30  }
 0x422   :  { %1988 = dma.done.wait [#allocation4], 256  }
 0x423   :  { %1989 = vsyncadd [#allocation4], 4294967040 }
 0x424   :  { %1699 = vsyncpa [#allocation3], 1 }
 0x425   :  { %1700 = vsyncpa [#allocation8], 1 }
 0x426   :  { %1701 = vsyncpa [#allocation11], 1 }
 0x427   :  { %1702 = vsyncpa [#allocation4], 1 }
 0x428   :  { %1703 = vsyncpa [#allocation5], 1 }

</bundles_post_ra>
